<compile_context>
chip_gen: v5e
topology: v5e:2x2
jax: 0.10.0
libtpu: 0.0.40
codegen_flags: <defaults>
</compile_context>

<pallas_src>
import functools

import jax
import jax.numpy as jnp
from jax import lax
from jax.experimental import pallas as pl
from jax.experimental.pallas import tpu as pltpu


def _round_up(x, m):
    return ((x + m - 1) // m) * m


def _pick_row_tile(h2, wc, max_conv_elems=4096):
    """Largest divisor of h2 whose conv tile (2*tr2 rows x wc cols) stays small."""
    best = 1
    for cand in range(1, h2 + 1):
        if h2 % cand == 0 and 2 * cand * wc <= max_conv_elems:
            best = cand
    return best


# ----------------------------- fused block kernel ---------------------------


def _conv_bn_act_pool_kernel(x_ref, w_ref, scale_ref, bias_ref, o_ref, pool_ref,
                             *, conv_rows, conv_cols, w2, offsets,
                             negative_slope):
    """Fused 3x3 conv + BN affine + (Leaky)ReLU + 2x2 max pool for one tile.

    x_ref:     (1, conv_rows + halo, conv_cols + halo, K) padded input slab
    w_ref:     (taps, K, Cout) conv weights, one (K, Cout) matrix per tap
    scale_ref: (1, Cout), bias_ref: (1, Cout)   folded inference BatchNorm
    o_ref:     (1, conv_rows // 2, w2, Cout)    pooled output block
    pool_ref:  VMEM scratch (conv_rows // 2, conv_cols, Cout) f32
    """
    k = w_ref.shape[1]
    cout = w_ref.shape[2]

    # 3x3 conv as accumulated matmuls over the (statically unrolled) taps.
    acc = None
    for t, (dh, dw) in enumerate(offsets):
        xt = x_ref[0, dh:dh + conv_rows, dw:dw + conv_cols, :]
        xt = xt.reshape(conv_rows * conv_cols, k)   # layout no-op (wc % 16 == 0)
        part = jnp.dot(xt, w_ref[t], preferred_element_type=jnp.float32)
        acc = part if acc is None else acc + part

    # BatchNorm affine + (Leaky)ReLU in f32.
    y = acc * scale_ref[...] + bias_ref[...]
    y = jnp.where(y > 0, y, y * negative_slope)

    # 2x2/stride-2 max pool (floor semantics: only rows/cols < 2*h2/2*w2 used).
    y = y.reshape(conv_rows // 2, 2, conv_cols, cout)
    pool_ref[...] = jnp.maximum(y[:, 0], y[:, 1])         # pool along H
    a = pool_ref[:, pl.ds(0, w2, 2), :]                   # even columns
    b = pool_ref[:, pl.ds(1, w2, 2), :]                   # odd columns
    o_ref[0] = jnp.maximum(a, b).astype(o_ref.dtype)      # pool along W


# ------------------------------ block wrapper --------------------------------


def conv_bn_act_pool_block(x_nhwc, w_hwio, bn_scale, bn_bias, *,
                           negative_slope=0.0, compute_dtype=jnp.bfloat16):
    """One Conv-4 block: conv3x3(pad=1) + BN + act + maxpool2. NHWC in/out."""
    n, h, w, cin = x_nhwc.shape
    cout = w_hwio.shape[-1]
    h2, w2 = h // 2, w // 2
    assert h2 >= 1 and w2 >= 1, "spatial dims too small for 2x2 pooling"

    # conv output columns computed per tile; multiple of 16 keeps every
    # in-kernel reshape a pure layout no-op for both f32 and bf16 operands.
    wc = max(16, _round_up(2 * w2, 16))
    # single zero-padded copy of the activation (SAME padding + right/bottom
    # slack up to the window actually touched by the kernel).
    xp = jnp.pad(x_nhwc, ((0, 0),
                          (1, 2 * h2 + 1 - h),
                          (1, wc + 1 - w),
                          (0, 0)))

    fold_taps = cin * 9 <= 64     # layer 1 (Cin=3): single K=27 im2col matmul
    if fold_taps:
        xin = jnp.concatenate(
            [xp[:, dh:dh + 2 * h2, dw:dw + wc, :]
             for dh in range(3) for dw in range(3)], axis=-1)
        wk = w_hwio.reshape(9 * cin, cout)[None]          # (1, 9*cin, cout)
        offsets = ((0, 0),)
        halo = 0
    else:
        xin = xp                                          # (n, 2*h2+2, wc+2, cin)
        wk = w_hwio.reshape(9, cin, cout)
        offsets = tuple((dh, dw) for dh in range(3) for dw in range(3))
        halo = 2
    k = wk.shape[1]
    wp = wc + halo

    # Row ("M") tiling: each grid step handles tr2 pooled rows of one image.
    tr2 = _pick_row_tile(h2, wc)
    n_tiles = h2 // tr2
    rows_in = 2 * tr2 + halo
    if n_tiles == 1:
        slabs = xin[:, :rows_in][:, None]
    else:  # duplicate only the 2-row conv halo per slab
        slabs = jnp.stack(
            [xin[:, 2 * tr2 * j:2 * tr2 * j + rows_in] for j in range(n_tiles)],
            axis=1)
    slabs = slabs.reshape(n * n_tiles, rows_in, wp, k).astype(compute_dtype)
    wk = wk.astype(compute_dtype)
    scale = bn_scale.reshape(1, cout).astype(jnp.float32)
    bias = bn_bias.reshape(1, cout).astype(jnp.float32)

    kern = functools.partial(
        _conv_bn_act_pool_kernel,
        conv_rows=2 * tr2, conv_cols=wc, w2=w2, offsets=offsets,
        negative_slope=negative_slope)

    out = pl.pallas_call(
        kern,
        out_shape=jax.ShapeDtypeStruct((n * n_tiles, tr2, w2, cout),
                                       compute_dtype),
        grid_spec=pltpu.PrefetchScalarGridSpec(
            num_scalar_prefetch=0,
            grid=(n * n_tiles,),
            in_specs=[
                pl.BlockSpec((1, rows_in, wp, k), lambda t: (t, 0, 0, 0)),
                pl.BlockSpec(wk.shape, lambda t: (0, 0, 0)),
                pl.BlockSpec((1, cout), lambda t: (0, 0)),
                pl.BlockSpec((1, cout), lambda t: (0, 0)),
            ],
            out_specs=pl.BlockSpec((1, tr2, w2, cout), lambda t: (t, 0, 0, 0)),
            scratch_shapes=[pltpu.VMEM((tr2, wc, cout), jnp.float32)],
        ),
        compiler_params=pltpu.CompilerParams(
            dimension_semantics=("parallel",),
            vmem_limit_bytes=32 * 1024 * 1024),
    )(slabs, wk, scale, bias)

    return out.reshape(n, h2, w2, cout)


# --------------------------- MetaTemplate (JAX) ------------------------------


class MetaTemplatePallas:
    """Pallas/TPU implementation of MetaTemplate.forward (Conv-4 feature
    extractor with inference-form BatchNorm)."""

    def __init__(self, params, n_way, n_support, flatten=True, leakyrelu=False,
                 change_way=True, compute_dtype=jnp.bfloat16):
        self.params = params              # list of (w_hwio, bn_scale, bn_bias)
        self.n_way = n_way
        self.n_support = n_support
        self.n_query = -1
        self.flatten = flatten
        self.negative_slope = 0.1 if leakyrelu else 0.0
        self.change_way = change_way
        self.compute_dtype = compute_dtype
        self.feat_dim = params[-1][0].shape[-1]

    def forward(self, x_nchw):
        x = jnp.transpose(x_nchw, (0, 2, 3, 1))           # NCHW -> NHWC
        for (w, s, b) in self.params:
            x = conv_bn_act_pool_block(
                x, w, s, b, negative_slope=self.negative_slope,
                compute_dtype=self.compute_dtype)
        x = x.astype(jnp.float32)
        if self.flatten:
            x = x.reshape(x.shape[0], -1)
        return x

    def parse_feature(self, x, is_feature):
        if is_feature:
            z_all = x
        else:
            x = x.reshape((self.n_way * (self.n_support + self.n_query),)
                          + x.shape[2:])
            z_all = self.forward(x)
            z_all = z_all.reshape(self.n_way, self.n_support + self.n_query, -1)
        z_support = z_all[:, :self.n_support]
        z_query = z_all[:, self.n_support:]
        return z_support, z_query

    # TODO(synk): set_forward / set_forward_loss / correct / train_loop /
    # test_loop are host-side training/eval orchestration (data loaders,
    # optimizers, KL-distillation losses, TensorBoard) -- not kernel work.


# ------------------------------ reference ------------------------------------


def reference_forward(x_nchw, params, negative_slope=0.0):
    x = jnp.transpose(x_nchw, (0, 2, 3, 1))
    for (w, scale, bias) in params:
        y = lax.conv_general_dilated(
            x, w, window_strides=(1, 1), padding="SAME",
            dimension_numbers=("NHWC", "HWIO", "NHWC"))
        y = y * scale.reshape(1, 1, 1, -1) + bias.reshape(1, 1, 1, -1)
        y = jnp.where(y > 0, y, negative_slope * y)
        x = lax.reduce_window(y, -jnp.inf, lax.max,
                              (1, 2, 2, 1), (1, 2, 2, 1), "VALID")
    return x.reshape(x.shape[0], -1)


# -------------------------------- main ---------------------------------------


if __name__ == "__main__":
    key = jax.random.PRNGKey(0)
    N, Cin, H, W = 2, 3, 16, 16          # small image-like input (NCHW)
    hidden = 32                          # Conv-4 hidden channels (small)
    n_blocks = 4
    chans = [Cin] + [hidden] * n_blocks

    keys = jax.random.split(key, 2 * n_blocks + 1)
    params = []
    eps = 1e-5
    for b in range(n_blocks):
        cin, cout = chans[b], chans[b + 1]
        w = jax.random.normal(keys[2 * b], (3, 3, cin, cout),
                              jnp.float32) / jnp.sqrt(9.0 * cin)
        gamma = 1.0 + 0.1 * jax.random.normal(keys[2 * b + 1], (cout,),
                                              jnp.float32)
        beta = 0.05 * jnp.arange(cout, dtype=jnp.float32) / cout
        running_mean = jnp.zeros((cout,), jnp.float32)
        running_var = jnp.ones((cout,), jnp.float32)
        scale = gamma * lax.rsqrt(running_var + eps)   # folded inference BN
        bias = beta - running_mean * scale
        params.append((w, scale, bias))

    x = jax.random.normal(keys[-1], (N, Cin, H, W), jnp.float32)
    ref = reference_forward(x, params, negative_slope=0.0)

    # f32-operand path: strict check against the XLA reference.
    model_f32 = MetaTemplatePallas(params, n_way=2, n_support=1, flatten=True,
                                   leakyrelu=False, compute_dtype=jnp.float32)
    out_f32 = jax.block_until_ready(model_f32.forward(x))
    assert out_f32.shape == (N, hidden), out_f32.shape
    assert jnp.allclose(out_f32, ref, atol=1e-3, rtol=1e-3), (
        float(jnp.max(jnp.abs(out_f32 - ref))))

    # bf16 MXU-operand path (f32 accumulation + f32 epilogue): looser check.
    model_bf16 = MetaTemplatePallas(params, n_way=2, n_support=1, flatten=True,
                                    leakyrelu=False, compute_dtype=jnp.bfloat16)
    out_bf16 = jax.block_until_ready(model_bf16.forward(x))
    assert out_bf16.shape == (N, hidden), out_bf16.shape
    assert jnp.allclose(out_bf16, ref, atol=0.15, rtol=0.1), (
        float(jnp.max(jnp.abs(out_bf16 - ref))))

    print("KERNEL_OK")
</pallas_src>

<mosaic_0001>
module attributes {stable_mosaic.version = 11 : i64} {
  func.func @_conv_bn_act_pool_kernel(%arg0: i32, %arg1: memref<1x16x16x27xf32, #tpu.memory_space<vmem>>, %arg2: memref<1x27x32xf32, #tpu.memory_space<vmem>>, %arg3: memref<1x32xf32, #tpu.memory_space<vmem>>, %arg4: memref<1x32xf32, #tpu.memory_space<vmem>>, %arg5: memref<1x8x8x32xf32, #tpu.memory_space<vmem>>, %arg6: memref<8x16x32xf32, #tpu.memory_space<vmem>>) attributes {dimension_semantics = [#tpu.dimension_semantics<parallel>], iteration_bounds = array<i64: 2>, scalar_prefetch = 0 : i64, scratch_operands = 1 : i64, tpu.core_type = #tpu.core_type<tc>, window_params = [{transform_indices = @transform_0, window_bounds = array<i64: 1, 16, 16, 27>}, {pipeline_mode = #tpu.pipeline_mode<synchronous>, transform_indices = @transform_1, window_bounds = array<i64: 1, 27, 32>}, {pipeline_mode = #tpu.pipeline_mode<synchronous>, transform_indices = @transform_2, window_bounds = array<i64: 1, 32>}, {pipeline_mode = #tpu.pipeline_mode<synchronous>, transform_indices = @transform_3, window_bounds = array<i64: 1, 32>}, {transform_indices = @transform_4, window_bounds = array<i64: 1, 8, 8, 32>}]} {
    %c0 = arith.constant 0 : index
    %c0_0 = arith.constant 0 : index
    %c0_1 = arith.constant 0 : index
    %c0_2 = arith.constant 0 : index
    %0 = vector.load %arg1[%c0, %c0_0, %c0_1, %c0_2] : memref<1x16x16x27xf32, #tpu.memory_space<vmem>>, vector<1x16x16x27xf32>
    %1 = vector.shape_cast %0 : vector<1x16x16x27xf32> to vector<16x16x27xf32>
    %2 = vector.shape_cast %1 : vector<16x16x27xf32> to vector<256x27xf32>
    %c0_3 = arith.constant 0 : index
    %c0_4 = arith.constant 0 : index
    %c0_5 = arith.constant 0 : index
    %3 = vector.load %arg2[%c0_3, %c0_4, %c0_5] : memref<1x27x32xf32, #tpu.memory_space<vmem>>, vector<1x27x32xf32>
    %4 = vector.shape_cast %3 : vector<1x27x32xf32> to vector<27x32xf32>
    %cst = arith.constant dense<0.000000e+00> : vector<256x32xf32>
    %5 = tpu.matmul %2, %4, %cst {dimension_numbers = #tpu.dot_dimension_numbers<[1], [0], [0], [1], [0, 0, 1, 1], [], []>} : vector<256x27xf32>, vector<27x32xf32>, vector<256x32xf32> -> vector<256x32xf32>
    %c0_6 = arith.constant 0 : index
    %c0_7 = arith.constant 0 : index
    %6 = vector.load %arg3[%c0_6, %c0_7] : memref<1x32xf32, #tpu.memory_space<vmem>>, vector<1x32xf32>
    %7 = vector.broadcast %6 : vector<1x32xf32> to vector<256x32xf32>
    %8 = arith.mulf %5, %7 : vector<256x32xf32>
    %c0_8 = arith.constant 0 : index
    %c0_9 = arith.constant 0 : index
    %9 = vector.load %arg4[%c0_8, %c0_9] : memref<1x32xf32, #tpu.memory_space<vmem>>, vector<1x32xf32>
    %10 = vector.broadcast %9 : vector<1x32xf32> to vector<256x32xf32>
    %11 = arith.addf %8, %10 : vector<256x32xf32>
    %cst_10 = arith.constant 0.000000e+00 : f32
    %12 = vector.broadcast %cst_10 : f32 to vector<256x32xf32>
    %13 = arith.cmpf ogt, %11, %12 : vector<256x32xf32>
    %cst_11 = arith.constant 0.000000e+00 : f32
    %14 = vector.broadcast %cst_11 : f32 to vector<256x32xf32>
    %15 = arith.mulf %11, %14 : vector<256x32xf32>
    %16 = arith.select %13, %11, %15 : vector<256x32xi1>, vector<256x32xf32>
    %17 = vector.shape_cast %16 : vector<256x32xf32> to vector<8x2x16x32xf32>
    %18 = vector.extract_strided_slice %17 {offsets = [0, 0, 0, 0], sizes = [8, 1, 16, 32], strides = [1, 1, 1, 1]} : vector<8x2x16x32xf32> to vector<8x1x16x32xf32>
    %19 = vector.shape_cast %18 : vector<8x1x16x32xf32> to vector<8x16x32xf32>
    %20 = vector.extract_strided_slice %17 {offsets = [0, 1, 0, 0], sizes = [8, 1, 16, 32], strides = [1, 1, 1, 1]} : vector<8x2x16x32xf32> to vector<8x1x16x32xf32>
    %21 = vector.shape_cast %20 : vector<8x1x16x32xf32> to vector<8x16x32xf32>
    %22 = arith.maximumf %19, %21 : vector<8x16x32xf32>
    %c0_12 = arith.constant 0 : index
    %c0_13 = arith.constant 0 : index
    %c0_14 = arith.constant 0 : index
    %23 = vector.load %arg6[%c0_12, %c0_13, %c0_14] : memref<8x16x32xf32, #tpu.memory_space<vmem>>, vector<8x16x32xf32>
    tpu.vector_store %arg6[%c0_12, %c0_13, %c0_14], %22 {strides = array<i32>} : memref<8x16x32xf32, #tpu.memory_space<vmem>>, vector<8x16x32xf32>,
    %c0_15 = arith.constant 0 : index
    %c0_16 = arith.constant 0 : index
    %c0_17 = arith.constant 0 : index
    %24 = tpu.strided_load %arg6[%c0_15, %c0_16, %c0_17] {strides = array<i32: 1, 2, 1>} : memref<8x16x32xf32, #tpu.memory_space<vmem>>, vector<8x8x32xf32>
    %c0_18 = arith.constant 0 : index
    %c1 = arith.constant 1 : index
    %c0_19 = arith.constant 0 : index
    %25 = tpu.strided_load %arg6[%c0_18, %c1, %c0_19] {strides = array<i32: 1, 2, 1>} : memref<8x16x32xf32, #tpu.memory_space<vmem>>, vector<8x8x32xf32>
    %26 = arith.maximumf %24, %25 : vector<8x8x32xf32>
    %c0_20 = arith.constant 0 : index
    %c0_21 = arith.constant 0 : index
    %c0_22 = arith.constant 0 : index
    %c0_23 = arith.constant 0 : index
    %27 = vector.load %arg5[%c0_20, %c0_21, %c0_22, %c0_23] : memref<1x8x8x32xf32, #tpu.memory_space<vmem>>, vector<1x8x8x32xf32>
    %28 = vector.shape_cast %27 : vector<1x8x8x32xf32> to vector<8x8x32xf32>
    %29 = vector.shape_cast %26 : vector<8x8x32xf32> to vector<1x8x8x32xf32>
    tpu.vector_store %arg5[%c0_20, %c0_21, %c0_22, %c0_23], %29 {strides = array<i32>} : memref<1x8x8x32xf32, #tpu.memory_space<vmem>>, vector<1x8x8x32xf32>,
    return
  }
  func.func @transform_0(%arg0: i32) -> (i32, i32, i32, i32) {
    %c0_i32 = arith.constant 0 : i32
    %c0_i32_0 = arith.constant 0 : i32
    %c0_i32_1 = arith.constant 0 : i32
    %c0_i32_2 = arith.constant 0 : i32
    return %arg0, %c0_i32, %c0_i32_0, %c0_i32_1 : i32, i32, i32, i32
  }
  func.func @transform_1(%arg0: i32) -> (i32, i32, i32) {
    %c0_i32 = arith.constant 0 : i32
    %c0_i32_0 = arith.constant 0 : i32
    %c0_i32_1 = arith.constant 0 : i32
    %c0_i32_2 = arith.constant 0 : i32
    return %c0_i32, %c0_i32_0, %c0_i32_1 : i32, i32, i32
  }
  func.func @transform_2(%arg0: i32) -> (i32, i32) {
    %c0_i32 = arith.constant 0 : i32
    %c0_i32_0 = arith.constant 0 : i32
    %c0_i32_1 = arith.constant 0 : i32
    return %c0_i32, %c0_i32_0 : i32, i32
  }
  func.func @transform_3(%arg0: i32) -> (i32, i32) {
    %c0_i32 = arith.constant 0 : i32
    %c0_i32_0 = arith.constant 0 : i32
    %c0_i32_1 = arith.constant 0 : i32
    return %c0_i32, %c0_i32_0 : i32, i32
  }
  func.func @transform_4(%arg0: i32) -> (i32, i32, i32, i32) {
    %c0_i32 = arith.constant 0 : i32
    %c0_i32_0 = arith.constant 0 : i32
    %c0_i32_1 = arith.constant 0 : i32
    %c0_i32_2 = arith.constant 0 : i32
    return %arg0, %c0_i32, %c0_i32_0, %c0_i32_1 : i32, i32, i32, i32
  }
}

</mosaic_0001>

<bundles_post_ra>
// kernel: tpu_custom_call.1
= control target key start
LH: loop header
LB: loop body
LE: loop exit
PB: predicated region body
PF: predicated region fallthrough
CT: control target
= control target key end

     0   :  { %9 = vsyncpa [#allocation4], 0  ;;  %s1369_s0 = inlined_call_operand.hbm [shape: f32[2,16,16,27], index: 0, kind: input, shape index: {}]   ;;  %s1370_s1 = inlined_call_operand.vmem [shape: f32[1,27,32], index: 1, kind: input, shape index: {}]   ;;  %s1371_s2 = inlined_call_operand.vmem [shape: f32[1,32], index: 2, kind: input, shape index: {}]   ;;  %s1372_s3 = inlined_call_operand.vmem [shape: f32[1,32], index: 3, kind: input, shape index: {}]   ;;  %s1373_s4 = inlined_call_operand.hbm [shape: f32[2,8,8,32], index: 4, kind: output, shape index: {}]  }
   0x1   :  { %11 = vsyncpa [#allocation4 + $0x1], 0 }
   0x2   :  { %12 = vsyncpa [#allocation5], 0 }
   0x3   :  { %14 = vsyncpa [#allocation5 + $0x1], 0  ;;  %s1045_s15 = smov 0   ;;  %s1047_s16 = smov 0  }
   0x4   :  { %s1049_s17 = smov 0   ;;  %s1051_s18 = smov 0  }
   0x5 LB: > { %s1066_s19 = sadd.s32 4294967295, %s1014_s18   ;;  %s805_s20 = sadd.s32 4294967294, %s1014_s18   ;;  %s1014_s18 = sphi %s1051_s18, %s1383_s18   ;;  %s1010_s17 = sphi %s1049_s17, %s1382_s17   ;;  %s1006_s16 = sphi %s1047_s16, %s1381_s16   ;;  %s1002_s15 = sphi %s1045_s15, %s1380_s15  }
   0x6   : > { %s1070_s21 = sadd.s32 1, %s1014_s18   ;;  %s27_s22 = sadd.s32 1, %s1010_s17 }
   0x7   : > { %s24_s23 = ssub.s32 %s1014_s18, %s1070_s21  ;;  %p34_p0 = scmp.ne.s32.totalorder %s1010_s17, %s1006_s16 }
   0x8   : > { %p25_p1 = scmp.eq.s32.totalorder %s24_s23, 0  ;;  %p35_p2 = scmp.eq.s32.totalorder %s1014_s18, 0 }
   0x9   : > { %p40_p3 = scmp.ne.s32.totalorder %s1006_s16, %s1002_s15  ;;  %p41_p4 = scmp.eq.s32.totalorder %s1066_s19, 0 }
   0xa   : > { %s1082_s24 = scalar_select %p25_p1, %s1010_s17, %s27_s22  }
   0xb   : > { %p1084_p5 = por %p35_p2, %p34_p0  ;;  %p1088_p6 = por %p41_p4, %p40_p3 }
   0xc   : > { %p127_p7 = scmp.eq.s32.totalorder %s1066_s19, 1  ;;  %p133_p8 = scmp.eq.s32.totalorder %s805_s20, 1 }
   0xd   : > { %p878_p10 = scmp.lt.s32.totalorder %s1014_s18, 2  ;;  %s162_s29 = sand.u32 1, %s1010_s17  }
   0xe   : > { %p1095_p11 = por %p127_p7, %p34_p0  ;;  %p1099_p12 = por %p133_p8, %p40_p3 }
   0xf   : > { %s852_s30 = sshll.u32 %s1014_s18, 8  ;;  %s808_s5 = sshll.u32 %s162_s29, 8 }
  0x10   : > { %s171_s8 = scalar_lea.hbm %s1369_s0, %s852_s30  ;;  %s166_s10 = scalar_lea.vmem [#allocation3], %s808_s5 }
  0x11   : > { %s172_s9 = sshll.u32 %s171_s8, 4  ;;  %s174_s11 = sshll.u32 %s166_s10, 4  ;;  %s173_s9 = int_to_ptr.hbm [resolvable:$true] %s172_s9  ;;  %s175_s11 = int_to_ptr.vmem [resolvable:$true] %s174_s11 }
  0x12   : > { %p1110_p13 = pnand %p878_p10, %p1084_p5  ;;  %p811_p0 = scmp.ge.s32.totalorder %s1014_s18, 1 }
  0x13   : > { %p182_p1 = scmp.lt.s32.totalorder %s1014_s18, 3  ;;  %s163_s13 = scalar_lea.sflag [#allocation4], %s162_s29 }
  0x14   : > { %s918_s14 = sshra.s32 %s173_s9, 4  ;;  %p922_p3 = pneg %p1110_p13  ;;  %s919_s14 = int_to_ptr.hbm [resolvable:$true] %s918_s14 }
  0x15   : > { %s920_s20 = scalar_lea.hbm %s919_s14, 256  ;;  %s925_s25 = scalar_lea.hbm %s1369_s0, 512 }
  0x16   : > { %p921_p2 = scmp.ne.s32.totalorder %s919_s14, %s920_s20  ;;  %p926_p5 = scmp.lt.s32.totalorder %s919_s14, %s1369_s0 }
  0x17   : > { %p927_p8 = scmp.lt.s32.totalorder %s925_s25, %s920_s20 }
  0x18   : > { %p923_p4 = pnand %p922_p3, %p921_p2 }
  0x19   : > { %p928_p10 = por %p927_p8, %p926_p5 }
  0x1a   : > { %p924_p7 = pneg %p923_p4 }
  0x1c   : > { %p929_p9 = pnand %p928_p10, %p924_p7 }
  0x1e   : > { %932 = shalt.err (!%p929_p9)
}
  0x1f   : > { %s1016_s29 = smov 128   ;;  %s1017_s6 = smov 8  }
  0x20   : > { %873 = dma.hbm_to_vmem [thread:$0]  (!%p1110_p13), %s173_s9, 4096, %s175_s11, %s163_s13, %s1016_s29, %s1016_s29, %s1017_s6  }
  0x21   : > { %p183_p2 = pnand %p811_p0, %p182_p1 }
  0x22   : > { %s1131_s7 = sand.u32 (!%p183_p2), 1, %s1006_s16  }
  0x23   : > { %186 = sbr.rel (%p183_p2) target bundleno = 263 (0x107), region = 36  ;;  %s812_s8 = sshll.u32 (!%p183_p2), %s1131_s7, 8 }
  0x24   : > { %s189_s10 = scalar_lea.sflag (!%p183_p2), [#allocation4], %s1131_s7  ;;  %s1135_s14 = scalar_lea.vmem (!%p183_p2), [#allocation3], %s812_s8 }
  0x28   : > { %993 = dma.done.wait (%p1088_p6), %s189_s10, 4096  }
  0x29   : > { %995 = vsyncadd (%p1088_p6), %s189_s10, 4294963200  ;;  %vm351_vm0 = vcmask 1042432   ;;  %v253_v0 = vld [vmem:[%s1370_s1 + $0x18] sm:$0x7]  ;;  %v252_v1 = vld [vmem:[%s1370_s1 + $0x10] sm:$0xff]  ;;  %vm254_vm1 = vcmask 220160  }
  0x2a   : > { %814 = vmatpush.msk.msra.mxu0 %vm351_vm0, %v253_v0  ;;  %854 = vmatpush.msk.msra.mxu1 %vm351_vm0, %v253_v0  ;;  %v251_v2 = vld [vmem:[%s1370_s1 + $0x8] sm:$0xff]  ;;  %v250_v3 = vld [vmem:[%s1370_s1] sm:$0xff]  ;;  %v220_v12 = vld [vmem:[%s1135_s14 + $0x10] sm:$0xff]  ;;  %vm652_vm4 = vcmask 261120   ;;  %s813_s6 = sshll.u32 %s1131_s7, 6  ;;  %s853_s10 = sshll.u32 %s1066_s19, 6 }
  0x2b   : > { %855 = vmatpush.msk.msra.mxu2 %vm351_vm0, %v253_v0  ;;  %856 = vmatpush.msk.msra.mxu3 %vm351_vm0, %v253_v0  ;;  %v218_v4 = vld [vmem:[%s1135_s14] sm:$0xff]  ;;  %v219_v8 = vld [vmem:[%s1135_s14 + $0x8] sm:$0xff]  ;;  %v228_v13 = vld [vmem:[%s1135_s14 + $0x50] sm:$0xff]  ;;  %s1278_s8 = scalar_lea.vmem [#allocation6], %s813_s6  ;;  %s728_s11 = scalar_lea.hbm %s1373_s4, %s853_s10 }
  0x2c   : > { %368 = vmatpush.msra.mxu0 %v252_v1  ;;  %857 = vmatpush.msra.mxu1 %v252_v1  ;;  %v226_v5 = vld [vmem:[%s1135_s14 + $0x40] sm:$0xff]  ;;  %v227_v9 = vld [vmem:[%s1135_s14 + $0x48] sm:$0xff]  ;;  %v236_v14 = vld [vmem:[%s1135_s14 + $0x90] sm:$0xff]  ;;  %s729_s19 = sshll.u32 %s1278_s8, 4  ;;  %s731_s12 = sshll.u32 %s728_s11, 4  ;;  %s730_s19 = int_to_ptr.vmem [resolvable:$true] %s729_s19  ;;  %s732_s12 = int_to_ptr.hbm [resolvable:$true] %s731_s12 }
  0x2d   : > { %858 = vmatpush.msra.mxu2 %v252_v1  ;;  %859 = vmatpush.msra.mxu3 %v252_v1  ;;  %v234_v6 = vld [vmem:[%s1135_s14 + $0x80] sm:$0xff]  ;;  %v235_v10 = vld [vmem:[%s1135_s14 + $0x88] sm:$0xff]  ;;  %v244_v15 = vld [vmem:[%s1135_s14 + $0xd0] sm:$0xff]  ;;  %s717_s13 = scalar_lea.sflag [#allocation5], %s1131_s7  ;;  %s962_s20 = sshra.s32 %s732_s12, 4  ;;  %s963_s20 = int_to_ptr.hbm [resolvable:$true] %s962_s20 }
  0x2e   : > { %369 = vmatpush.msra.mxu0 %v251_v2  ;;  %860 = vmatpush.msra.mxu1 %v251_v2  ;;  %v242_v7 = vld [vmem:[%s1135_s14 + $0xc0] sm:$0xff]  ;;  %v243_v11 = vld [vmem:[%s1135_s14 + $0xc8] sm:$0xff]  ;;  %v221_v16 = vld [vmem:[%s1135_s14 + $0x18] sm:$0xff]  ;;  %s964_s22 = scalar_lea.hbm %s963_s20, 64  ;;  %s968_s25 = scalar_lea.hbm %s1373_s4, 128 }
  0x2f   : > { %861 = vmatpush.msra.mxu2 %v251_v2  ;;  %862 = vmatpush.msra.mxu3 %v251_v2  ;;  %v229_v17 = vld [vmem:[%s1135_s14 + $0x58] sm:$0xff]  ;;  %v222_v20 = vld [vmem:[%s1135_s14 + $0x20] sm:$0xff]  ;;  %v223_v24 = vld [vmem:[%s1135_s14 + $0x28] sm:$0xff]  ;;  %p965_p6 = scmp.ne.s32.totalorder %s963_s20, %s964_s22  ;;  %p969_p0 = scmp.lt.s32.totalorder %s963_s20, %s1373_s4 }
  0x30   : > { %370 = vmatpush.msra.mxu0 %v250_v3  ;;  %863 = vmatpush.msra.mxu1 %v250_v3  ;;  %v237_v18 = vld [vmem:[%s1135_s14 + $0x98] sm:$0xff]  ;;  %v230_v21 = vld [vmem:[%s1135_s14 + $0x60] sm:$0xff]  ;;  %v231_v25 = vld [vmem:[%s1135_s14 + $0x68] sm:$0xff]  ;;  %p970_p1 = scmp.lt.s32.totalorder %s968_s25, %s964_s22 }
  0x31   : > { %864 = vmatpush.msra.mxu2 %v250_v3  ;;  %865 = vmatpush.msra.mxu3 %v250_v3  ;;  %v245_v19 = vld [vmem:[%s1135_s14 + $0xd8] sm:$0xff]  ;;  %v238_v22 = vld [vmem:[%s1135_s14 + $0xa0] sm:$0xff]  ;;  %v239_v26 = vld [vmem:[%s1135_s14 + $0xa8] sm:$0xff]  ;;  %p966_p9 = pnand %p965_p6, %p1095_p11 }
  0x32   : > { %815 = vmatmul.msk.f32.vlgmr.msra.gmra.mxu0 %vm254_vm1, %v218_v4  ;;  %823 = vmatmul.msk.f32.vlgmr.msra.gmra.mxu1 %vm254_vm1, %v226_v5  ;;  %v246_v23 = vld [vmem:[%s1135_s14 + $0xe0] sm:$0xff]  ;;  %v247_v27 = vld [vmem:[%s1135_s14 + $0xe8] sm:$0xff]  ;;  %v224_v28 = vld [vmem:[%s1135_s14 + $0x30] sm:$0xff]  ;;  %p971_p3 = por %p970_p1, %p969_p0 }
  0x33   : > { %831 = vmatmul.msk.f32.vlgmr.msra.gmra.mxu2 %vm254_vm1, %v234_v6  ;;  %839 = vmatmul.msk.f32.vlgmr.msra.gmra.mxu3 %vm254_vm1, %v242_v7  ;;  %v232_v29 = vld [vmem:[%s1135_s14 + $0x70] sm:$0xff]  ;;  %v225_v32 = vld [vmem:[%s1135_s14 + $0x38] sm:$0xff]  ;;  %v1220_v38 = vld [vmem:[%s1371_s2] ss:$0 sm:$0xff]  ;;  %p967_p13 = pneg %p966_p9 }
  0x34   : > { %v240_v30 = vld [vmem:[%s1135_s14 + $0xb0] sm:$0xff]  ;;  %v233_v33 = vld [vmem:[%s1135_s14 + $0x78] sm:$0xff]  ;;  %v1226_v42 = vld [vmem:[%s1372_s3] ss:$0 sm:$0xff] }
  0x35   : > { %v248_v31 = vld [vmem:[%s1135_s14 + $0xf0] sm:$0xff]  ;;  %v241_v34 = vld [vmem:[%s1135_s14 + $0xb8] sm:$0xff]  ;;  %p972_p4 = pnand %p971_p3, %p967_p13 }
  0x36   : > { %v249_v35 = vld [vmem:[%s1135_s14 + $0xf8] sm:$0xff] }
  0x3a   : > { %816 = vmatmul.msk.f32.gmra.mxu0 %vm254_vm1, %v219_v8  ;;  %824 = vmatmul.msk.f32.gmra.mxu1 %vm254_vm1, %v227_v9 }
  0x3b   : > { %832 = vmatmul.msk.f32.gmra.mxu2 %vm254_vm1, %v235_v10  ;;  %840 = vmatmul.msk.f32.gmra.mxu3 %vm254_vm1, %v243_v11 }
  0x42   : > { %817 = vmatmul.msk.f32.gmra.mxu0 %vm254_vm1, %v220_v12  ;;  %825 = vmatmul.msk.f32.gmra.mxu1 %vm254_vm1, %v228_v13 }
  0x43   : > { %833 = vmatmul.msk.f32.gmra.mxu2 %vm254_vm1, %v236_v14  ;;  %841 = vmatmul.msk.f32.gmra.mxu3 %vm254_vm1, %v244_v15 }
  0x4a   : > { %818 = vmatmul.msk.f32.gmra.mxu0 %vm254_vm1, %v221_v16  ;;  %826 = vmatmul.msk.f32.gmra.mxu1 %vm254_vm1, %v229_v17 }
  0x4b   : > { %834 = vmatmul.msk.f32.gmra.mxu2 %vm254_vm1, %v237_v18  ;;  %842 = vmatmul.msk.f32.gmra.mxu3 %vm254_vm1, %v245_v19 }
  0x52   : > { %819 = vmatmul.msk.f32.gmra.mxu0 %vm254_vm1, %v222_v20  ;;  %827 = vmatmul.msk.f32.gmra.mxu1 %vm254_vm1, %v230_v21 }
  0x53   : > { %835 = vmatmul.msk.f32.gmra.mxu2 %vm254_vm1, %v238_v22  ;;  %843 = vmatmul.msk.f32.gmra.mxu3 %vm254_vm1, %v246_v23 }
  0x5a   : > { %820 = vmatmul.msk.f32.gmra.mxu0 %vm254_vm1, %v223_v24  ;;  %828 = vmatmul.msk.f32.gmra.mxu1 %vm254_vm1, %v231_v25 }
  0x5b   : > { %836 = vmatmul.msk.f32.gmra.mxu2 %vm254_vm1, %v239_v26  ;;  %844 = vmatmul.msk.f32.gmra.mxu3 %vm254_vm1, %v247_v27 }
  0x62   : > { %821 = vmatmul.msk.f32.gmra.mxu0 %vm254_vm1, %v224_v28  ;;  %829 = vmatmul.msk.f32.gmra.mxu1 %vm254_vm1, %v232_v29 }
  0x63   : > { %837 = vmatmul.msk.f32.gmra.mxu2 %vm254_vm1, %v240_v30  ;;  %845 = vmatmul.msk.f32.gmra.mxu3 %vm254_vm1, %v248_v31 }
  0x6a   : > { %822 = vmatmul.msk.f32.gmra.mxu0 %vm254_vm1, %v225_v32  ;;  %830 = vmatmul.msk.f32.gmra.mxu1 %vm254_vm1, %v233_v33 }
  0x6b   : > { %838 = vmatmul.msk.f32.gmra.mxu2 %vm254_vm1, %v241_v34  ;;  %846 = vmatmul.msk.f32.gmra.mxu3 %vm254_vm1, %v249_v35 }
  0xaf   : > { %v372_v36 = vpop.f32.mrf.mxu0  ;;  %v396_v37 = vpop.f32.mrf.mxu1 }
  0xb0   : > { %v472_v41 = vmul.f32 %v1220_v38, %v372_v36  ;;  %v480_v43 = vmul.f32 %v1220_v38, %v396_v37 }
  0xb2   : > { %v508_v46 = vadd.f32 %v1226_v42, %v472_v41  ;;  %v516_v47 = vadd.f32 %v1226_v42, %v480_v43 }
  0xb4   : > { %v572_v54 = vmul.f32 0.0, %v508_v46  ;;  %v580_v55 = vmul.f32 0.0, %v516_v47  ;;  %vm540_vm2 = vcmp.gt.f32.partialorder %v508_v46, 0.0  ;;  %vm548_vm3 = vcmp.gt.f32.partialorder %v516_v47, 0.0 }
  0xb6   : > { %v420_v39 = vpop.f32.mrf.mxu2  ;;  %v444_v40 = vpop.f32.mrf.mxu3  ;;  %v604_v2 = vsel %vm540_vm2, %v508_v46, %v572_v54  ;;  %v612_v3 = vsel %vm548_vm3, %v516_v47, %v580_v55 }
  0xb7   : > { %v375_v44 = vpop.f32.mrf.mxu0  ;;  %v399_v45 = vpop.f32.mrf.mxu1  ;;  %v488_v48 = vmul.f32 %v1220_v38, %v420_v39  ;;  %v496_v49 = vmul.f32 %v1220_v38, %v444_v40 }
  0xb8   : > { %v473_v50 = vmul.f32 %v1220_v38, %v375_v44  ;;  %v481_v51 = vmul.f32 %v1220_v38, %v399_v45 }
  0xb9   : > { %v524_v56 = vadd.f32 %v1226_v42, %v488_v48  ;;  %v532_v57 = vadd.f32 %v1226_v42, %v496_v49 }
  0xba   : > { %v509_v62 = vadd.f32 %v1226_v42, %v473_v50  ;;  %v517_v63 = vadd.f32 %v1226_v42, %v481_v51 }
  0xbb   : > { %v588_v4 = vmul.f32 0.0, %v524_v56  ;;  %v596_v5 = vmul.f32 0.0, %v532_v57  ;;  %vm556_vm7 = vcmp.gt.f32.partialorder %v524_v56, 0.0  ;;  %vm564_vm8 = vcmp.gt.f32.partialorder %v532_v57, 0.0 }
  0xbc   : > { %vm541_vm9 = vcmp.gt.f32.partialorder %v509_v62, 0.0  ;;  %v573_v8 = vmul.f32 0.0, %v509_v62  ;;  %vm549_vm10 = vcmp.gt.f32.partialorder %v517_v63, 0.0  ;;  %v581_v9 = vmul.f32 0.0, %v517_v63 }
  0xbd   : > { %v620_v20 = vsel %vm556_vm7, %v524_v56, %v588_v4  ;;  %v628_v21 = vsel %vm564_vm8, %v532_v57, %v596_v5 }
  0xbe   : > { %v423_v52 = vpop.f32.mrf.mxu2  ;;  %v447_v53 = vpop.f32.mrf.mxu3  ;;  %v605_v28 = vsel %vm541_vm9, %v509_v62, %v573_v8  ;;  %v613_v29 = vsel %vm549_vm10, %v517_v63, %v581_v9 }
  0xbf   : > { %v378_v58 = vpop.f32.mrf.mxu0  ;;  %v402_v59 = vpop.f32.mrf.mxu1  ;;  %v489_v24 = vmul.f32 %v1220_v38, %v423_v52  ;;  %v497_v25 = vmul.f32 %v1220_v38, %v447_v53 }
  0xc0   : > { %v474_v60 = vmul.f32 %v1220_v38, %v378_v58  ;;  %v482_v61 = vmul.f32 %v1220_v38, %v402_v59 }
  0xc1   : > { %v525_v36 = vadd.f32 %v1226_v42, %v489_v24  ;;  %v533_v37 = vadd.f32 %v1226_v42, %v497_v25 }
  0xc2   : > { %v510_v0 = vadd.f32 %v1226_v42, %v474_v60  ;;  %v518_v1 = vadd.f32 %v1226_v42, %v482_v61 }
  0xc3   : > { %v589_v54 = vmul.f32 0.0, %v525_v36  ;;  %v597_v55 = vmul.f32 0.0, %v533_v37  ;;  %vm557_vm15 = vcmp.gt.f32.partialorder %v525_v36, 0.0  ;;  %vm565_vm0 = vcmp.gt.f32.partialorder %v533_v37, 0.0 }
  0xc4   : > { %vm542_vm5 = vcmp.gt.f32.partialorder %v510_v0, 0.0  ;;  %v574_v6 = vmul.f32 0.0, %v510_v0  ;;  %vm550_vm6 = vcmp.gt.f32.partialorder %v518_v1, 0.0  ;;  %v582_v7 = vmul.f32 0.0, %v518_v1 }
  0xc5   : > { %v621_v60 = vsel %vm557_vm15, %v525_v36, %v589_v54  ;;  %v629_v61 = vsel %vm565_vm0, %v533_v37, %v597_v55 }
  0xc6   : > { %v606_v10 = vsel %vm542_vm5, %v510_v0, %v574_v6  ;;  %v614_v11 = vsel %vm550_vm6, %v518_v1, %v582_v7  ;;  %v426_v12 = vpop.f32.mrf.mxu2  ;;  %v450_v13 = vpop.f32.mrf.mxu3 }
  0xc7   : > { %v636_v14 = vmax.f32 %v604_v2, %v606_v10  ;;  %v640_v15 = vmax.f32 %v612_v3, %v614_v11  ;;  %v490_v16 = vmul.f32 %v1220_v38, %v426_v12  ;;  %v498_v17 = vmul.f32 %v1220_v38, %v450_v13  ;;  %v381_v18 = vpop.f32.mrf.mxu0  ;;  %v405_v19 = vpop.f32.mrf.mxu1 }
  0xc8   : > { %v475_v22 = vmul.f32 %v1220_v38, %v381_v18  ;;  %v483_v23 = vmul.f32 %v1220_v38, %v405_v19 }
  0xc9   : > { %653 = vst.msk [vmem:[#allocation2] sm:$0xff] %vm652_vm4, %v636_v14  ;;  %v526_v26 = vadd.f32 %v1226_v42, %v490_v16  ;;  %v534_v27 = vadd.f32 %v1226_v42, %v498_v17 }
  0xca   : > { %657 = vst.msk [vmem:[#allocation2 + $0x20] sm:$0xff] %vm652_vm4, %v640_v15  ;;  %v511_v30 = vadd.f32 %v1226_v42, %v475_v22  ;;  %v519_v31 = vadd.f32 %v1226_v42, %v483_v23 }
  0xcb   : > { %vm558_vm11 = vcmp.gt.f32.partialorder %v526_v26, 0.0  ;;  %v590_v32 = vmul.f32 0.0, %v526_v26  ;;  %vm566_vm12 = vcmp.gt.f32.partialorder %v534_v27, 0.0  ;;  %v598_v33 = vmul.f32 0.0, %v534_v27 }
  0xcc   : > { %vm543_vm13 = vcmp.gt.f32.partialorder %v511_v30, 0.0  ;;  %v575_v34 = vmul.f32 0.0, %v511_v30  ;;  %vm551_vm14 = vcmp.gt.f32.partialorder %v519_v31, 0.0  ;;  %v583_v35 = vmul.f32 0.0, %v519_v31 }
  0xcd   : > { %v622_v39 = vsel %vm558_vm11, %v526_v26, %v590_v32  ;;  %v630_v40 = vsel %vm566_vm12, %v534_v27, %v598_v33 }
  0xce   : > { %v644_v41 = vmax.f32 %v620_v20, %v622_v39  ;;  %v648_v43 = vmax.f32 %v628_v21, %v630_v40  ;;  %v607_v44 = vsel %vm543_vm13, %v511_v30, %v575_v34  ;;  %v615_v45 = vsel %vm551_vm14, %v519_v31, %v583_v35  ;;  %v429_v46 = vpop.f32.mrf.mxu2  ;;  %v453_v47 = vpop.f32.mrf.mxu3 }
  0xcf   : > { %v637_v48 = vmax.f32 %v605_v28, %v607_v44  ;;  %v641_v49 = vmax.f32 %v613_v29, %v615_v45  ;;  %v491_v50 = vmul.f32 %v1220_v38, %v429_v46  ;;  %v499_v51 = vmul.f32 %v1220_v38, %v453_v47  ;;  %v384_v52 = vpop.f32.mrf.mxu0  ;;  %v408_v53 = vpop.f32.mrf.mxu1 }
  0xd0   : > { %661 = vst.msk [vmem:[#allocation2 + $0x40] sm:$0xff] %vm652_vm4, %v644_v41  ;;  %v476_v2 = vmul.f32 %v1220_v38, %v384_v52  ;;  %v484_v5 = vmul.f32 %v1220_v38, %v408_v53 }
  0xd1   : > { %665 = vst.msk [vmem:[#allocation2 + $0x60] sm:$0xff] %vm652_vm4, %v648_v43  ;;  %v527_v56 = vadd.f32 %v1226_v42, %v491_v50  ;;  %v535_v57 = vadd.f32 %v1226_v42, %v499_v51 }
  0xd2   : > { %654 = vst.msk [vmem:[#allocation2 + $0x8] sm:$0xff] %vm652_vm4, %v637_v48  ;;  %v512_v13 = vadd.f32 %v1226_v42, %v476_v2  ;;  %v520_v15 = vadd.f32 %v1226_v42, %v484_v5 }
  0xd3   : > { %658 = vst.msk [vmem:[#allocation2 + $0x28] sm:$0xff] %vm652_vm4, %v641_v49  ;;  %vm559_vm1 = vcmp.gt.f32.partialorder %v527_v56, 0.0  ;;  %v591_v58 = vmul.f32 0.0, %v527_v56  ;;  %vm567_vm2 = vcmp.gt.f32.partialorder %v535_v57, 0.0  ;;  %v599_v59 = vmul.f32 0.0, %v535_v57 }
  0xd4   : > { %vm544_vm3 = vcmp.gt.f32.partialorder %v512_v13, 0.0  ;;  %v576_v24 = vmul.f32 0.0, %v512_v13  ;;  %v584_v25 = vmul.f32 0.0, %v520_v15  ;;  %vm552_vm5 = vcmp.gt.f32.partialorder %v520_v15, 0.0 }
  0xd5   : > { %v623_v62 = vsel %vm559_vm1, %v527_v56, %v591_v58  ;;  %v631_v63 = vsel %vm567_vm2, %v535_v57, %v599_v59 }
  0xd6   : > { %v645_v0 = vmax.f32 %v621_v60, %v623_v62  ;;  %v649_v1 = vmax.f32 %v629_v61, %v631_v63  ;;  %v432_v3 = vpop.f32.mrf.mxu2  ;;  %v456_v4 = vpop.f32.mrf.mxu3  ;;  %v608_v41 = vsel %vm544_vm3, %v512_v13, %v576_v24  ;;  %v616_v43 = vsel %vm552_vm5, %v520_v15, %v584_v25 }
  0xd7   : > { %v387_v6 = vpop.f32.mrf.mxu0  ;;  %v411_v7 = vpop.f32.mrf.mxu1  ;;  %v492_v16 = vmul.f32 %v1220_v38, %v432_v3  ;;  %v500_v17 = vmul.f32 %v1220_v38, %v456_v4 }
  0xd8   : > { %662 = vst.msk [vmem:[#allocation2 + $0x48] sm:$0xff] %vm652_vm4, %v645_v0  ;;  %v477_v18 = vmul.f32 %v1220_v38, %v387_v6  ;;  %v485_v19 = vmul.f32 %v1220_v38, %v411_v7 }
  0xd9   : > { %v669_v8 = vld [vmem:[#allocation2] ss:$2 sm:$0xff]  ;;  %v685_v9 = vld [vmem:[#allocation2 + $0x1] ss:$2 sm:$0xff]  ;;  %666 = vst.msk [vmem:[#allocation2 + $0x68] sm:$0xff] %vm652_vm4, %v649_v1  ;;  %v528_v26 = vadd.f32 %v1226_v42, %v492_v16  ;;  %v536_v27 = vadd.f32 %v1226_v42, %v500_v17 }
  0xda   : > { %v700_v10 = vmax.f32 %v669_v8, %v685_v9  ;;  %v673_v11 = vld [vmem:[#allocation2 + $0x20] ss:$2 sm:$0xff]  ;;  %v689_v12 = vld [vmem:[#allocation2 + $0x21] ss:$2 sm:$0xff]  ;;  %v513_v36 = vadd.f32 %v1226_v42, %v477_v18  ;;  %v521_v37 = vadd.f32 %v1226_v42, %v485_v19 }
  0xdb   : > { %v702_v14 = vmax.f32 %v673_v11, %v689_v12  ;;  %v592_v44 = vmul.f32 0.0, %v528_v26  ;;  %v600_v45 = vmul.f32 0.0, %v536_v27  ;;  %vm560_vm8 = vcmp.gt.f32.partialorder %v528_v26, 0.0 }
  0xdc   : > { %708 = vst.msk [vmem:[%s1278_s8] sm:$0xff] %vm652_vm4, %v700_v10  ;;  %vm568_vm9 = vcmp.gt.f32.partialorder %v536_v27, 0.0  ;;  %vm545_vm10 = vcmp.gt.f32.partialorder %v513_v36, 0.0  ;;  %v577_v48 = vmul.f32 0.0, %v513_v36  ;;  %vm553_vm11 = vcmp.gt.f32.partialorder %v521_v37, 0.0 }
  0xdd   : > { %710 = vst.msk [vmem:[%s1278_s8 + $0x10] sm:$0xff] %vm652_vm4, %v702_v14  ;;  %v585_v49 = vmul.f32 0.0, %v521_v37  ;;  %v624_v60 = vsel %vm560_vm8, %v528_v26, %v592_v44  ;;  %v632_v61 = vsel %vm568_vm9, %v536_v27, %v600_v45 }
  0xde   : > { %v435_v20 = vpop.f32.mrf.mxu2  ;;  %v459_v21 = vpop.f32.mrf.mxu3  ;;  %v609_v4 = vsel %vm545_vm10, %v513_v36, %v577_v48 }
  0xdf   : > { %v677_v22 = vld [vmem:[#allocation2 + $0x40] ss:$2 sm:$0xff]  ;;  %v693_v23 = vld [vmem:[#allocation2 + $0x41] ss:$2 sm:$0xff]  ;;  %v390_v28 = vpop.f32.mrf.mxu0  ;;  %v414_v29 = vpop.f32.mrf.mxu1  ;;  %v493_v0 = vmul.f32 %v1220_v38, %v435_v20  ;;  %v501_v1 = vmul.f32 %v1220_v38, %v459_v21  ;;  %v617_v5 = vsel %vm553_vm11, %v521_v37, %v585_v49 }
  0xe0   : > { %v704_v30 = vmax.f32 %v677_v22, %v693_v23  ;;  %v681_v31 = vld [vmem:[#allocation2 + $0x60] ss:$2 sm:$0xff]  ;;  %v697_v32 = vld [vmem:[#allocation2 + $0x61] ss:$2 sm:$0xff]  ;;  %v478_v33 = vmul.f32 %v1220_v38, %v390_v28  ;;  %v486_v34 = vmul.f32 %v1220_v38, %v414_v29 }
  0xe1   : > { %v706_v35 = vmax.f32 %v681_v31, %v697_v32  ;;  %v529_v12 = vadd.f32 %v1226_v42, %v493_v0  ;;  %v537_v13 = vadd.f32 %v1226_v42, %v501_v1 }
  0xe2   : > { %v514_v39 = vadd.f32 %v1226_v42, %v478_v33  ;;  %v522_v40 = vadd.f32 %v1226_v42, %v486_v34  ;;  %712 = vst.msk [vmem:[%s1278_s8 + $0x20] sm:$0xff] %vm652_vm4, %v704_v30 }
  0xe3   : > { %714 = vst.msk [vmem:[%s1278_s8 + $0x30] sm:$0xff] %vm652_vm4, %v706_v35  ;;  %v593_v26 = vmul.f32 0.0, %v529_v12  ;;  %v601_v27 = vmul.f32 0.0, %v537_v13  ;;  %vm561_vm0 = vcmp.gt.f32.partialorder %v529_v12, 0.0  ;;  %vm569_vm1 = vcmp.gt.f32.partialorder %v537_v13, 0.0 }
  0xe4   : > { %vm546_vm6 = vcmp.gt.f32.partialorder %v514_v39, 0.0  ;;  %v578_v46 = vmul.f32 0.0, %v514_v39  ;;  %vm554_vm7 = vcmp.gt.f32.partialorder %v522_v40, 0.0  ;;  %v586_v47 = vmul.f32 0.0, %v522_v40 }
  0xe5   : > { %v625_v31 = vsel %vm561_vm0, %v529_v12, %v593_v26  ;;  %v633_v32 = vsel %vm569_vm1, %v537_v13, %v601_v27 }
  0xe6   : > { %v610_v50 = vsel %vm546_vm6, %v514_v39, %v578_v46  ;;  %v618_v51 = vsel %vm554_vm7, %v522_v40, %v586_v47  ;;  %v438_v52 = vpop.f32.mrf.mxu2  ;;  %v462_v53 = vpop.f32.mrf.mxu3 }
  0xe7   : > { %v638_v54 = vmax.f32 %v608_v41, %v610_v50  ;;  %v642_v55 = vmax.f32 %v616_v43, %v618_v51  ;;  %v494_v56 = vmul.f32 %v1220_v38, %v438_v52  ;;  %v502_v57 = vmul.f32 %v1220_v38, %v462_v53  ;;  %v393_v58 = vpop.f32.mrf.mxu0  ;;  %v417_v59 = vpop.f32.mrf.mxu1 }
  0xe8   : > { %v479_v62 = vmul.f32 %v1220_v38, %v393_v58  ;;  %v487_v63 = vmul.f32 %v1220_v38, %v417_v59 }
  0xe9   : > { %655 = vst.msk [vmem:[#allocation2 + $0x10] sm:$0xff] %vm652_vm4, %v638_v54  ;;  %v530_v2 = vadd.f32 %v1226_v42, %v494_v56  ;;  %v538_v3 = vadd.f32 %v1226_v42, %v502_v57 }
  0xea   : > { %659 = vst.msk [vmem:[#allocation2 + $0x30] sm:$0xff] %vm652_vm4, %v642_v55  ;;  %v515_v6 = vadd.f32 %v1226_v42, %v479_v62  ;;  %v523_v7 = vadd.f32 %v1226_v42, %v487_v63 }
  0xeb   : > { %vm562_vm12 = vcmp.gt.f32.partialorder %v530_v2, 0.0  ;;  %v594_v8 = vmul.f32 0.0, %v530_v2  ;;  %vm570_vm13 = vcmp.gt.f32.partialorder %v538_v3, 0.0  ;;  %v602_v9 = vmul.f32 0.0, %v538_v3 }
  0xec   : > { %vm547_vm14 = vcmp.gt.f32.partialorder %v515_v6, 0.0  ;;  %v579_v10 = vmul.f32 0.0, %v515_v6  ;;  %vm555_vm15 = vcmp.gt.f32.partialorder %v523_v7, 0.0  ;;  %v587_v11 = vmul.f32 0.0, %v523_v7 }
  0xed   : > { %v626_v14 = vsel %vm562_vm12, %v530_v2, %v594_v8  ;;  %v634_v15 = vsel %vm570_vm13, %v538_v3, %v602_v9 }
  0xee   : > { %v646_v16 = vmax.f32 %v624_v60, %v626_v14  ;;  %v650_v17 = vmax.f32 %v632_v61, %v634_v15  ;;  %v611_v18 = vsel %vm547_vm14, %v515_v6, %v579_v10  ;;  %v619_v19 = vsel %vm555_vm15, %v523_v7, %v587_v11  ;;  %v441_v20 = vpop.f32.mrf.mxu2  ;;  %v465_v21 = vpop.f32.mrf.mxu3 }
  0xef   : > { %v639_v22 = vmax.f32 %v609_v4, %v611_v18  ;;  %v643_v23 = vmax.f32 %v617_v5, %v619_v19  ;;  %v495_v24 = vmul.f32 %v1220_v38, %v441_v20  ;;  %v503_v25 = vmul.f32 %v1220_v38, %v465_v21 }
  0xf0   : > { %663 = vst.msk [vmem:[#allocation2 + $0x50] sm:$0xff] %vm652_vm4, %v646_v16 }
  0xf1   : > { %667 = vst.msk [vmem:[#allocation2 + $0x70] sm:$0xff] %vm652_vm4, %v650_v17  ;;  %v531_v28 = vadd.f32 %v1226_v42, %v495_v24  ;;  %v539_v29 = vadd.f32 %v1226_v42, %v503_v25 }
  0xf2   : > { %656 = vst.msk [vmem:[#allocation2 + $0x18] sm:$0xff] %vm652_vm4, %v639_v22 }
  0xf3   : > { %660 = vst.msk [vmem:[#allocation2 + $0x38] sm:$0xff] %vm652_vm4, %v643_v23  ;;  %vm563_vm2 = vcmp.gt.f32.partialorder %v531_v28, 0.0  ;;  %v595_v30 = vmul.f32 0.0, %v531_v28  ;;  %vm571_vm3 = vcmp.gt.f32.partialorder %v539_v29, 0.0  ;;  %v603_v38 = vmul.f32 0.0, %v539_v29 }
  0xf5   : > { %v627_v33 = vsel %vm563_vm2, %v531_v28, %v595_v30  ;;  %v635_v34 = vsel %vm571_vm3, %v539_v29, %v603_v38 }
  0xf6   : > { %v647_v35 = vmax.f32 %v625_v31, %v627_v33  ;;  %v651_v36 = vmax.f32 %v633_v32, %v635_v34 }
  0xf8   : > { %664 = vst.msk [vmem:[#allocation2 + $0x58] sm:$0xff] %vm652_vm4, %v647_v35 }
  0xf9   : > { %v671_v42 = vld [vmem:[#allocation2 + $0x10] ss:$2 sm:$0xff]  ;;  %v687_v37 = vld [vmem:[#allocation2 + $0x11] ss:$2 sm:$0xff]  ;;  %668 = vst.msk [vmem:[#allocation2 + $0x78] sm:$0xff] %vm652_vm4, %v651_v36 }
  0xfa   : > { %v701_v39 = vmax.f32 %v671_v42, %v687_v37  ;;  %v675_v40 = vld [vmem:[#allocation2 + $0x30] ss:$2 sm:$0xff]  ;;  %v691_v41 = vld [vmem:[#allocation2 + $0x31] ss:$2 sm:$0xff] }
  0xfb   : > { %v703_v43 = vmax.f32 %v675_v40, %v691_v41 }
  0xfc   : > { %709 = vst.msk [vmem:[%s1278_s8 + $0x8] sm:$0xff] %vm652_vm4, %v701_v39 }
  0xfd   : > { %711 = vst.msk [vmem:[%s1278_s8 + $0x18] sm:$0xff] %vm652_vm4, %v703_v43 }
  0xff   : > { %v679_v44 = vld [vmem:[#allocation2 + $0x50] ss:$2 sm:$0xff]  ;;  %v695_v45 = vld [vmem:[#allocation2 + $0x51] ss:$2 sm:$0xff] }
 0x100   : > { %v705_v46 = vmax.f32 %v679_v44, %v695_v45  ;;  %v683_v47 = vld [vmem:[#allocation2 + $0x70] ss:$2 sm:$0xff]  ;;  %v699_v48 = vld [vmem:[#allocation2 + $0x71] ss:$2 sm:$0xff] }
 0x101   : > { %v707_v49 = vmax.f32 %v683_v47, %v699_v48 }
 0x102   : > { %713 = vst.msk [vmem:[%s1278_s8 + $0x28] sm:$0xff] %vm652_vm4, %v705_v46 }
 0x103   : > { %715 = vst.msk [vmem:[%s1278_s8 + $0x38] sm:$0xff] %vm652_vm4, %v707_v49 }
 0x104   : > { %975 = shalt.err (!%p972_p4)
}
 0x105   : > { %s1018_s7 = smov 128   ;;  %s1019_s29 = smov 8  }
 0x106   : > { %868 = dma.vmem_to_hbm [thread:$0]  (%p1095_p11), %s730_s19, 1024, %s732_s12, %s717_s13, %s1018_s7, %s1018_s7, %s1019_s29  }
 0x107 PF: > { %s746_s6 = sand.u32 1, %s1002_s15   ;;  %p1379_p7 = scmp.ge.s32.totalorder %s1014_s18, 2 }
 0x108   : > { %s747_s8 = scalar_lea.sflag [#allocation5], %s746_s6 }
 0x109   : > { %p875_p5 = pnand %p1379_p7, %p1099_p12 }
 0x10b   : > { %p876_p8 = pneg %p875_p5 }
 0x10d   : > { %997 = dma.done.wait (%p876_p8), %s747_s8, 1024  }
 0x10e   : > { %999 = vsyncadd (%p876_p8), %s747_s8, 4294966272  ;;  %p17_p10 = scmp.ge.s32.totalorder %s1070_s21, 4   ;;  %s1380_s15 = smov %s1006_s16 }
 0x10f   : > { %s1381_s16 = smov %s1010_s17  ;;  %s1382_s17 = smov %s1082_s24 }
 0x110   : > { %s1383_s18 = smov %s1070_s21  ;;  %19 = sbr.rel (!%p17_p10) target bundleno = 5 (0x5), region = 96 }
 0x115   :  { %753 = vsyncpa [#allocation4], 1 }
 0x116   :  { %755 = vsyncpa [#allocation4 + $0x1], 1 }
 0x117   :  { %756 = vsyncpa [#allocation5], 1 }
 0x118   :  { %758 = vsyncpa [#allocation5 + $0x1], 1 }

</bundles_post_ra>
